<compile_context>
chip_gen: v6e
topology: v6e:2x2x1
jax: 0.10.0
libtpu: 0.0.40
codegen_flags: <defaults>
</compile_context>

<pallas_src>
import jax
import jax.numpy as jnp
from jax.experimental import pallas as pl
from jax.experimental.pallas import tpu as pltpu

LANE = 128
SUBLANE = 8
IMG_DIM = 512   # fixed by nn.Linear(512, hidden_size) in the module
MAX_TB = 512    # past the tile-size sweep knee; bigger buys nothing
NUM_TC = 2      # v7x has 2 TensorCores; harmless over-split on v5e/v6e


def _round_up(x, m):
    return (x + m - 1) // m * m


# ----------------------------------------------------------------------------
# Pallas kernel: fused projections + fusion MLP + sigmoid
# ----------------------------------------------------------------------------
def clip_head_kernel(
    xt_ref,      # (TB, Dt_pad)  bf16  text embeddings (feature-padded)
    xi_ref,      # (TB, Di_pad)  bf16  image embeddings (feature-padded)
    wt_ref,      # (Dt_pad, Hp)  bf16  text projection weight
    wi_ref,      # (Di_pad, Hp)  bf16  image projection weight
    w1_ref,      # (2Hp, Hp)     bf16  stacked fusion Linear(2H->H) weight
    consts_ref,  # (3, 2Hp)      f32   row0=[bt|bi], row1=[b1|0], row2=[w2|0]
    b2_ref,      # (1, 1)        f32   SMEM scalar (final bias)
    out_ref,     # (TB, 1)       f32   sigmoid probabilities (4 B/row writeback)
):
    Hp = w1_ref.shape[1]

    # Packed small constants (single DMA), sliced statically.
    bp = consts_ref[0:1, :]        # (1, 2Hp)
    b1 = consts_ref[1:2, :Hp]      # (1, Hp)
    w2 = consts_ref[2:3, :Hp]      # (1, Hp)

    # Two dense projection matmuls (no block-diagonal zero-MACs); torch.cat is
    # folded into lane placement: text -> lanes [0,Hp), image -> lanes [Hp,2Hp).
    pt = jnp.dot(xt_ref[...], wt_ref[...], preferred_element_type=jnp.float32)
    pi = jnp.dot(xi_ref[...], wi_ref[...], preferred_element_type=jnp.float32)
    a = jnp.maximum(jnp.concatenate([pt, pi], axis=-1) + bp, 0.0)  # (TB, 2Hp) f32

    # TODO(synk): nn.Dropout(0.3) layers are identity here (eval-mode semantics).

    # Fusion Linear(2H -> H): one stacked matmul (bf16 operands, f32 acc) + ReLU.
    h = jnp.dot(a.astype(w1_ref.dtype), w1_ref[...],
                preferred_element_type=jnp.float32) + b1
    h = jnp.maximum(h, 0.0)

    # Fusion Linear(H -> 1): VPU multiply + XLU lane reduction (no N=1 MXU op).
    logits = jnp.sum(h * w2, axis=-1, keepdims=True) + b2_ref[0, 0]   # (TB, 1)
    out_ref[...] = jax.nn.sigmoid(logits)                              # f32, EUP


# ----------------------------------------------------------------------------
# Wrapper-side packing (done once per parameter set, not per call)
# ----------------------------------------------------------------------------
def pack_head_params(p, compute_dtype=jnp.bfloat16, feature_pad=LANE):
    """Pads / repacks the head parameters into MXU-friendly bf16 operands.

    feature_pad=128 is optimal on v5e; pass 256 to match the v6e/v7x MXU native
    width (realistic CLIP hidden sizes 512/768 are already 256-multiples, so
    this costs nothing there).
    """
    Dt, H = p["wt"].shape
    Di = p["wi"].shape[0]
    Dt_pad = _round_up(Dt, LANE)
    Di_pad = _round_up(Di, LANE)
    Hp = _round_up(H, feature_pad)
    H2 = 2 * Hp

    wt = jnp.zeros((Dt_pad, Hp), jnp.float32).at[:Dt, :H].set(p["wt"])
    wi = jnp.zeros((Di_pad, Hp), jnp.float32).at[:Di, :H].set(p["wi"])

    # Stacked fusion Linear(2H -> H) weight: text rows at offset 0, image rows
    # at offset Hp (matching the lane placement of the concatenated activation).
    w1 = jnp.zeros((H2, Hp), jnp.float32)
    w1 = w1.at[:H, :H].set(p["w1"][:H])
    w1 = w1.at[Hp:Hp + H, :H].set(p["w1"][H:])

    # All small (1, *) constants packed into one f32 array -> one DMA.
    consts = jnp.zeros((3, H2), jnp.float32)
    consts = consts.at[0, :H].set(p["bt"][0])
    consts = consts.at[0, Hp:Hp + H].set(p["bi"][0])
    consts = consts.at[1, :H].set(p["b1"][0])
    consts = consts.at[2, :H].set(p["w2"][:, 0])

    return {
        "wt": wt.astype(compute_dtype),
        "wi": wi.astype(compute_dtype),
        "w1": w1.astype(compute_dtype),
        "consts": consts,
        "b2": p["b2"].reshape(1, 1).astype(jnp.float32),
        "Dt": Dt, "Di": Di, "Dt_pad": Dt_pad, "Di_pad": Di_pad,
        "Hp": Hp, "H2": H2,
    }


def _pick_batch_tile(B):
    """2-TensorCore-aware batch tile: >= NUM_TC balanced grid steps when B allows."""
    k = max(1, pl.cdiv(B, NUM_TC * MAX_TB))
    tb = _round_up(max(pl.cdiv(B, NUM_TC * k), 1), SUBLANE)
    return min(tb, MAX_TB)


def clip_only_classifier_head(text_embeds, image_embeds, packed):
    """Runs the CLIPOnlyClassifier head (post-encoder) as one Pallas kernel."""
    B, Dt = text_embeds.shape
    Di = image_embeds.shape[1]
    Dt_pad, Di_pad = packed["Dt_pad"], packed["Di_pad"]
    Hp, H2 = packed["Hp"], packed["H2"]
    compute_dtype = packed["wt"].dtype

    TB = _pick_batch_tile(B)
    B_pad = _round_up(B, TB)

    # Cast to the matmul dtype *before* any padding; no f32 activation stream
    # is ever materialized in HBM (text / image stay separate kernel inputs).
    xt = jnp.pad(text_embeds.astype(compute_dtype),
                 ((0, B_pad - B), (0, Dt_pad - Dt)))
    xi = jnp.pad(image_embeds.astype(compute_dtype),
                 ((0, B_pad - B), (0, Di_pad - Di)))

    grid = (B_pad // TB,)
    out = pl.pallas_call(
        clip_head_kernel,
        out_shape=jax.ShapeDtypeStruct((B_pad, 1), jnp.float32),
        grid=grid,
        in_specs=[
            pl.BlockSpec((TB, Dt_pad), lambda i: (i, 0)),        # text activations (tiled over B)
            pl.BlockSpec((TB, Di_pad), lambda i: (i, 0)),        # image activations (tiled over B)
            pl.BlockSpec((Dt_pad, Hp), lambda i: (0, 0)),        # Wt (resident, DMA'd once)
            pl.BlockSpec((Di_pad, Hp), lambda i: (0, 0)),        # Wi (resident)
            pl.BlockSpec((H2, Hp), lambda i: (0, 0)),            # W1 (resident)
            pl.BlockSpec((3, H2), lambda i: (0, 0)),             # packed biases + w2 row (one DMA)
            pl.BlockSpec(memory_space=pltpu.MemorySpace.SMEM),   # b2 scalar
        ],
        out_specs=pl.BlockSpec((TB, 1), lambda i: (i, 0)),       # 4 B/row writeback
        compiler_params=pltpu.CompilerParams(
            dimension_semantics=("parallel",)),                  # shard batch grid over TCs (v7x)
        # NOTE: if H/TB ever grow, single-buffer the resident weight specs
        # (pipeline_mode=pl.Buffered(1)) and set vmem_limit_bytes explicitly;
        # at these sizes the default scoped VMEM has ample headroom.
    )(xt, xi, packed["wt"], packed["wi"], packed["w1"],
      packed["consts"], packed["b2"])

    return out[:B]


# ----------------------------------------------------------------------------
# Deterministic stand-in for the CLIP encoder (plain JAX glue)
# ----------------------------------------------------------------------------
def standin_clip_encoder(input_ids, attention_mask, pixel_values, enc_params):
    # TODO(synk): the real CLIP text/vision transformer has no direct Pallas
    # translation here; this deterministic stand-in only produces embeddings
    # with the correct shapes/dtypes for the classifier head.
    tok = enc_params["tok_emb"][input_ids]                      # (B, S, Dt)
    m = attention_mask[..., None].astype(jnp.float32)           # (B, S, 1)
    text_embeds = (tok * m).sum(axis=1) / jnp.maximum(m.sum(axis=1), 1.0)  # (B, Dt)

    # layout: pixel_values is NCHW; pool over spatial dims, project to 512.
    pix = pixel_values.mean(axis=(2, 3))                        # (B, C)
    image_embeds = pix @ enc_params["img_proj"]                 # (B, 512)
    return text_embeds, image_embeds


# ----------------------------------------------------------------------------
# Parameters + pure-JAX reference of the head (for a correctness check)
# ----------------------------------------------------------------------------
def make_params(key, text_hidden, hidden):
    ks = jax.random.split(key, 8)
    s = 0.02
    return {
        "wt": s * jax.random.normal(ks[0], (text_hidden, hidden), jnp.float32),
        "bt": s * jax.random.normal(ks[1], (1, hidden), jnp.float32),
        "wi": s * jax.random.normal(ks[2], (IMG_DIM, hidden), jnp.float32),
        "bi": s * jax.random.normal(ks[3], (1, hidden), jnp.float32),
        "w1": s * jax.random.normal(ks[4], (2 * hidden, hidden), jnp.float32),
        "b1": s * jax.random.normal(ks[5], (1, hidden), jnp.float32),
        "w2": s * jax.random.normal(ks[6], (hidden, 1), jnp.float32),
        "b2": s * jax.random.normal(ks[7], (1, 1), jnp.float32),
    }


def reference_head(text_embeds, image_embeds, p):
    tp = text_embeds @ p["wt"] + p["bt"]
    ip = image_embeds @ p["wi"] + p["bi"]
    a = jnp.maximum(jnp.concatenate([tp, ip], axis=1), 0.0)
    h = jnp.maximum(a @ p["w1"] + p["b1"], 0.0)
    logits = h @ p["w2"] + p["b2"]
    return jax.nn.sigmoid(logits)


if __name__ == "__main__":
    key = jax.random.PRNGKey(0)

    # Small shapes consistent with the module's forward.
    B, S, VOCAB = 2, 8, 64
    TEXT_HIDDEN = 32          # stand-in for clip text_config.hidden_size
    HIDDEN = 32               # hidden_size of the classifier head
    C, H, W = 3, 16, 16       # pixel_values NCHW

    k_in, k_enc, k_head = jax.random.split(key, 3)
    k1, k2, k3, k4 = jax.random.split(k_in, 4)

    clip_input_ids = jax.random.randint(k1, (B, S), 0, VOCAB, jnp.int32)
    clip_attention_mask = jnp.ones((B, S), jnp.int32)
    pixel_values = jax.random.normal(k2, (B, C, H, W), jnp.float32)

    enc_params = {
        "tok_emb": 0.02 * jax.random.normal(k3, (VOCAB, TEXT_HIDDEN), jnp.float32),
        "img_proj": 0.02 * jax.random.normal(k4, (C, IMG_DIM), jnp.float32),
    }
    head_params = make_params(k_head, TEXT_HIDDEN, HIDDEN)
    packed = pack_head_params(head_params, compute_dtype=jnp.bfloat16)

    text_embeds, image_embeds = standin_clip_encoder(
        clip_input_ids, clip_attention_mask, pixel_values, enc_params
    )

    out = clip_only_classifier_head(text_embeds, image_embeds, packed)
    out = jax.block_until_ready(out)

    ref = reference_head(text_embeds, image_embeds, head_params)

    assert out.shape == (B, 1) and out.dtype == jnp.float32
    assert bool(jnp.all(jnp.isfinite(out)))
    assert bool(jnp.all((out >= 0.0) & (out <= 1.0)))
    assert bool(jnp.max(jnp.abs(out - ref)) < 2e-2)  # bf16-matmul tolerance
    print("KERNEL_OK")
</pallas_src>

<mosaic_0001>
module attributes {stable_mosaic.version = 11 : i64} {
  func.func @clip_head_kernel(%arg0: i32, %arg1: memref<8x128xbf16, #tpu.memory_space<vmem>>, %arg2: memref<8x512xbf16, #tpu.memory_space<vmem>>, %arg3: memref<128x128xbf16, #tpu.memory_space<vmem>>, %arg4: memref<512x128xbf16, #tpu.memory_space<vmem>>, %arg5: memref<256x128xbf16, #tpu.memory_space<vmem>>, %arg6: memref<3x256xf32, #tpu.memory_space<vmem>>, %arg7: memref<1x1xf32, #tpu.memory_space<smem>>, %arg8: memref<8x1xf32, #tpu.memory_space<vmem>>) attributes {dimension_semantics = [#tpu.dimension_semantics<parallel>], iteration_bounds = array<i64: 1>, scalar_prefetch = 0 : i64, scratch_operands = 0 : i64, tpu.core_type = #tpu.core_type<tc>, window_params = [{transform_indices = @transform_0, window_bounds = array<i64: 8, 128>}, {transform_indices = @transform_1, window_bounds = array<i64: 8, 512>}, {pipeline_mode = #tpu.pipeline_mode<synchronous>, transform_indices = @transform_2, window_bounds = array<i64: 128, 128>}, {pipeline_mode = #tpu.pipeline_mode<synchronous>, transform_indices = @transform_3, window_bounds = array<i64: 512, 128>}, {pipeline_mode = #tpu.pipeline_mode<synchronous>, transform_indices = @transform_4, window_bounds = array<i64: 256, 128>}, {pipeline_mode = #tpu.pipeline_mode<synchronous>, transform_indices = @transform_5, window_bounds = array<i64: 3, 256>}, {transform_indices = @transform_6, window_bounds = array<i64: 1, 1>}, {transform_indices = @transform_7, window_bounds = array<i64: 8, 1>}]} {
    %c0 = arith.constant 0 : index
    %c0_0 = arith.constant 0 : index
    %0 = vector.load %arg6[%c0, %c0_0] : memref<3x256xf32, #tpu.memory_space<vmem>>, vector<1x256xf32>
    %c1 = arith.constant 1 : index
    %c0_1 = arith.constant 0 : index
    %1 = vector.load %arg6[%c1, %c0_1] : memref<3x256xf32, #tpu.memory_space<vmem>>, vector<1x128xf32>
    %c2 = arith.constant 2 : index
    %c0_2 = arith.constant 0 : index
    %2 = vector.load %arg6[%c2, %c0_2] : memref<3x256xf32, #tpu.memory_space<vmem>>, vector<1x128xf32>
    %c0_3 = arith.constant 0 : index
    %c0_4 = arith.constant 0 : index
    %3 = vector.load %arg1[%c0_3, %c0_4] : memref<8x128xbf16, #tpu.memory_space<vmem>>, vector<8x128xbf16>
    %c0_5 = arith.constant 0 : index
    %c0_6 = arith.constant 0 : index
    %4 = vector.load %arg3[%c0_5, %c0_6] : memref<128x128xbf16, #tpu.memory_space<vmem>>, vector<128x128xbf16>
    %cst = arith.constant dense<0.000000e+00> : vector<8x128xf32>
    %5 = tpu.matmul %3, %4, %cst {dimension_numbers = #tpu.dot_dimension_numbers<[1], [0], [0], [1], [0, 0, 1, 1], [], []>} : vector<8x128xbf16>, vector<128x128xbf16>, vector<8x128xf32> -> vector<8x128xf32>
    %c0_7 = arith.constant 0 : index
    %c0_8 = arith.constant 0 : index
    %6 = vector.load %arg2[%c0_7, %c0_8] : memref<8x512xbf16, #tpu.memory_space<vmem>>, vector<8x512xbf16>
    %c0_9 = arith.constant 0 : index
    %c0_10 = arith.constant 0 : index
    %7 = vector.load %arg4[%c0_9, %c0_10] : memref<512x128xbf16, #tpu.memory_space<vmem>>, vector<512x128xbf16>
    %cst_11 = arith.constant dense<0.000000e+00> : vector<8x128xf32>
    %8 = tpu.matmul %6, %7, %cst_11 {dimension_numbers = #tpu.dot_dimension_numbers<[1], [0], [0], [1], [0, 0, 1, 1], [], []>} : vector<8x512xbf16>, vector<512x128xbf16>, vector<8x128xf32> -> vector<8x128xf32>
    %9 = tpu.concatenate %5, %8 in 1 : vector<8x128xf32>, vector<8x128xf32> -> vector<8x256xf32>
    %10 = vector.broadcast %0 : vector<1x256xf32> to vector<8x256xf32>
    %11 = arith.addf %9, %10 : vector<8x256xf32>
    %cst_12 = arith.constant 0.000000e+00 : f32
    %12 = vector.broadcast %cst_12 : f32 to vector<8x256xf32>
    %13 = arith.maximumf %11, %12 : vector<8x256xf32>
    %14 = arith.truncf %13 : vector<8x256xf32> to vector<8x256xbf16>
    %c0_13 = arith.constant 0 : index
    %c0_14 = arith.constant 0 : index
    %15 = vector.load %arg5[%c0_13, %c0_14] : memref<256x128xbf16, #tpu.memory_space<vmem>>, vector<256x128xbf16>
    %cst_15 = arith.constant dense<0.000000e+00> : vector<8x128xf32>
    %16 = tpu.matmul %14, %15, %cst_15 {dimension_numbers = #tpu.dot_dimension_numbers<[1], [0], [0], [1], [0, 0, 1, 1], [], []>} : vector<8x256xbf16>, vector<256x128xbf16>, vector<8x128xf32> -> vector<8x128xf32>
    %17 = vector.broadcast %1 : vector<1x128xf32> to vector<8x128xf32>
    %18 = arith.addf %16, %17 : vector<8x128xf32>
    %cst_16 = arith.constant 0.000000e+00 : f32
    %19 = vector.broadcast %cst_16 : f32 to vector<8x128xf32>
    %20 = arith.maximumf %18, %19 : vector<8x128xf32>
    %21 = vector.broadcast %2 : vector<1x128xf32> to vector<8x128xf32>
    %22 = arith.mulf %20, %21 : vector<8x128xf32>
    %cst_17 = arith.constant dense<0.000000e+00> : vector<8xf32>
    %23 = vector.multi_reduction <add>, %22, %cst_17 [1] : vector<8x128xf32> to vector<8xf32>
    %24 = vector.shape_cast %23 : vector<8xf32> to vector<8x1xf32>
    %c0_18 = arith.constant 0 : index
    %c0_19 = arith.constant 0 : index
    %25 = memref.load %arg7[%c0_18, %c0_19] : memref<1x1xf32, #tpu.memory_space<smem>>
    %26 = vector.broadcast %25 : f32 to vector<8x1xf32>
    %27 = arith.addf %24, %26 : vector<8x1xf32>
    %28 = arith.negf %27 : vector<8x1xf32>
    %29 = math.exp %28 : vector<8x1xf32>
    %cst_20 = arith.constant 1.000000e+00 : f32
    %30 = vector.broadcast %cst_20 : f32 to vector<8x1xf32>
    %31 = arith.addf %30, %29 : vector<8x1xf32>
    %32 = arith.divf %30, %31 : vector<8x1xf32>
    %c0_21 = arith.constant 0 : index
    %c0_22 = arith.constant 0 : index
    %33 = vector.load %arg8[%c0_21, %c0_22] : memref<8x1xf32, #tpu.memory_space<vmem>>, vector<8x1xf32>
    tpu.vector_store %arg8[%c0_21, %c0_22], %32 {strides = array<i32>} : memref<8x1xf32, #tpu.memory_space<vmem>>, vector<8x1xf32>,
    return
  }
  func.func @transform_0(%arg0: i32) -> (i32, i32) {
    %c0_i32 = arith.constant 0 : i32
    %c0_i32_0 = arith.constant 0 : i32
    return %arg0, %c0_i32 : i32, i32
  }
  func.func @transform_1(%arg0: i32) -> (i32, i32) {
    %c0_i32 = arith.constant 0 : i32
    %c0_i32_0 = arith.constant 0 : i32
    return %arg0, %c0_i32 : i32, i32
  }
  func.func @transform_2(%arg0: i32) -> (i32, i32) {
    %c0_i32 = arith.constant 0 : i32
    %c0_i32_0 = arith.constant 0 : i32
    %c0_i32_1 = arith.constant 0 : i32
    return %c0_i32, %c0_i32_0 : i32, i32
  }
  func.func @transform_3(%arg0: i32) -> (i32, i32) {
    %c0_i32 = arith.constant 0 : i32
    %c0_i32_0 = arith.constant 0 : i32
    %c0_i32_1 = arith.constant 0 : i32
    return %c0_i32, %c0_i32_0 : i32, i32
  }
  func.func @transform_4(%arg0: i32) -> (i32, i32) {
    %c0_i32 = arith.constant 0 : i32
    %c0_i32_0 = arith.constant 0 : i32
    %c0_i32_1 = arith.constant 0 : i32
    return %c0_i32, %c0_i32_0 : i32, i32
  }
  func.func @transform_5(%arg0: i32) -> (i32, i32) {
    %c0_i32 = arith.constant 0 : i32
    %c0_i32_0 = arith.constant 0 : i32
    %c0_i32_1 = arith.constant 0 : i32
    return %c0_i32, %c0_i32_0 : i32, i32
  }
  func.func @transform_6(%arg0: i32) -> (i32, i32) {
    %c0_i32 = arith.constant 0 : i32
    %c0_i32_0 = arith.constant 0 : i32
    %c0_i32_1 = arith.constant 0 : i32
    return %c0_i32, %c0_i32_0 : i32, i32
  }
  func.func @transform_7(%arg0: i32) -> (i32, i32) {
    %c0_i32 = arith.constant 0 : i32
    %c0_i32_0 = arith.constant 0 : i32
    return %arg0, %c0_i32 : i32, i32
  }
}

</mosaic_0001>

<bundles_post_ra>
// kernel: tpu_custom_call.1
= control target key start
LH: loop header
LB: loop body
LE: loop exit
PB: predicated region body
PF: predicated region fallthrough
CT: control target
= control target key end

     0   :  { %13 = vsyncpa [#allocation4], 0  ;;  %s1192_s0 = inlined_call_operand.hbm [shape: bf16[8,128], index: 0, kind: input, shape index: {}]   ;;  %s1193_s1 = inlined_call_operand.hbm [shape: bf16[8,512], index: 1, kind: input, shape index: {}]   ;;  %s1194_s2 = inlined_call_operand.hbm [shape: bf16[128,128], index: 2, kind: input, shape index: {}]   ;;  %s1195_s3 = inlined_call_operand.hbm [shape: bf16[512,128], index: 3, kind: input, shape index: {}]   ;;  %s1196_s4 = inlined_call_operand.hbm [shape: bf16[256,128], index: 4, kind: input, shape index: {}]   ;;  %s1197_s5 = inlined_call_operand.vmem [shape: f32[3,256], index: 5, kind: input, shape index: {}]   ;;  %s1198_s6 = inlined_call_operand.<no memory space> [shape: f32[1,1], index: 6, kind: input, shape index: {}]   ;;  %s1199_s7 = inlined_call_operand.vmem [shape: f32[8,1], index: 7, kind: output, shape index: {}]  }
   0x1   :  { %14 = vsyncpa [#allocation6], 0 }
   0x2   :  { %15 = vsyncpa [#allocation9], 0  ;;  %s1104_s24 = smov [#allocation5]  }
   0x3   :  { %s32_s25 = sshll.u32 %s1104_s24, 4  ;;  %s33_s25 = int_to_ptr.vmem [resolvable:$true] %s32_s25 }
   0x4   :  { %s1006_s26 = scalar_lea.vmem %s33_s25, 256  ;;  %p1011_p1 = scmp.lt.s32.totalorder %s33_s25, %s33_s25 }
   0x5   :  { %p1007_p0 = scmp.ne.s32.totalorder %s33_s25, %s1006_s26  ;;  %p1012_p2 = scmp.lt.s32.totalorder %s1006_s26, %s1006_s26 }
   0x7   :  { %p1013_p3 = por %p1012_p2, %p1011_p1 }
   0x9   :  { %p1014_p4 = pnand %p1013_p3, %p1007_p0 }
   0xb   :  { %1017 = shalt.err (!%p1014_p4)
}
   0xc   :  { %35 = dma.hbm_to_vmem [thread:$0]  %s1193_s1, 256, %s33_s25, [#allocation6]  }
   0xd   :  { %s1105_s29 = smov [#allocation8]   ;;  %s1106_s8 = smov [#allocation3]  }
   0xe   :  { %s53_s30 = sshll.u32 %s1105_s29, 4  ;;  %s22_s9 = sshll.u32 %s1106_s8, 4  ;;  %s54_s30 = int_to_ptr.vmem [resolvable:$true] %s53_s30  ;;  %s23_s9 = int_to_ptr.vmem [resolvable:$true] %s22_s9 }
   0xf   :  { %s1026_s10 = scalar_lea.vmem %s54_s30, 4096  ;;  %p1031_p6 = scmp.lt.s32.totalorder %s54_s30, %s54_s30 }
  0x10   :  { %p1027_p5 = scmp.ne.s32.totalorder %s54_s30, %s1026_s10  ;;  %p1032_p7 = scmp.lt.s32.totalorder %s1026_s10, %s1026_s10 }
  0x12   :  { %p1033_p8 = por %p1032_p7, %p1031_p6 }
  0x14   :  { %p1034_p9 = pnand %p1033_p8, %p1027_p5 }
  0x16   :  { %1037 = shalt.err (!%p1034_p9)
}
  0x17   :  { %s1107_s11 = smov 64   ;;  %s1108_s12 = smov 4  }
  0x18   :  { %59 = dma.hbm_to_vmem [thread:$0]  %s1195_s3, 4096, %s54_s30, [#allocation9], %s1107_s11, %s1107_s11, %s1108_s12  }
  0x19   :  { %s1046_s1 = scalar_lea.vmem %s23_s9, 64  ;;  %p1051_p11 = scmp.lt.s32.totalorder %s23_s9, %s23_s9 }
  0x1a   :  { %p1047_p10 = scmp.ne.s32.totalorder %s23_s9, %s1046_s1  ;;  %p1052_p12 = scmp.lt.s32.totalorder %s1046_s1, %s1046_s1 }
  0x1c   :  { %p1053_p13 = por %p1052_p12, %p1051_p11 }
  0x1e   :  { %p1054_p0 = pnand %p1053_p13, %p1047_p10 }
  0x20   :  { %1057 = shalt.err (!%p1054_p0)
}
  0x21   :  { %25 = dma.hbm_to_vmem [thread:$0]  %s1192_s0, 64, %s23_s9, [#allocation4]  }
  0x22   :  { %s1109_s17 = smov [#allocation7]   ;;  %s1110_s19 = smov [#allocation10]  }
  0x23   :  { %s41_s18 = sshll.u32 %s1109_s17, 4  ;;  %s65_s20 = sshll.u32 %s1110_s19, 4  ;;  %s42_s18 = int_to_ptr.vmem [resolvable:$true] %s41_s18  ;;  %s66_s20 = int_to_ptr.vmem [resolvable:$true] %s65_s20 }
  0x24   :  { %s1066_s21 = scalar_lea.vmem %s42_s18, 1024  ;;  %p1071_p2 = scmp.lt.s32.totalorder %s42_s18, %s42_s18 }
  0x25   :  { %p1067_p1 = scmp.ne.s32.totalorder %s42_s18, %s1066_s21  ;;  %p1072_p3 = scmp.lt.s32.totalorder %s1066_s21, %s1066_s21 }
  0x27   :  { %p1073_p4 = por %p1072_p3, %p1071_p2 }
  0x29   :  { %p1074_p5 = pnand %p1073_p4, %p1067_p1 }
  0x2b   :  { %1077 = shalt.err (!%p1074_p5)
}
  0x2c   :  { %47 = dma.hbm_to_vmem [thread:$0]  %s1194_s2, 1024, %s42_s18, [#allocation6], %s1107_s11, %s1107_s11, %s1108_s12  }
  0x2d   :  { %s1086_s0 = scalar_lea.vmem %s66_s20, 2048  ;;  %p1091_p7 = scmp.lt.s32.totalorder %s66_s20, %s66_s20 }
  0x2e   :  { %p1087_p6 = scmp.ne.s32.totalorder %s66_s20, %s1086_s0  ;;  %p1092_p8 = scmp.lt.s32.totalorder %s1086_s0, %s1086_s0 }
  0x30   :  { %p1093_p9 = por %p1092_p8, %p1091_p7 }
  0x32   :  { %p1094_p10 = pnand %p1093_p9, %p1087_p6 }
  0x34   :  { %1097 = shalt.err (!%p1094_p10)
}
  0x35   :  { %71 = dma.hbm_to_vmem [thread:$0]  %s1196_s4, 2048, %s66_s20, [#allocation9], %s1107_s11, %s1107_s11, %s1108_s12  }
  0x36   :  { %1098 = dma.done.wait [#allocation4], 64  }
  0x37   :  { %1099 = vsyncadd [#allocation4], 4294967232 }
  0x38   :  { %1100 = dma.done.wait [#allocation6], 1280  }
  0x39   :  { %1101 = vsyncadd [#allocation6], 4294966016 }
  0x3a   :  { %1102 = dma.done.wait [#allocation9], 6144  }
  0x3b   :  { %1103 = vsyncadd [#allocation9], 4294961152  ;;  %v1111_v0 = vmov 0.0   ;;  %vm1112_vm0 = vmmov 0   ;;  %v934_v1 = vld [vmem:[#allocation7 + $0x38] sm:$0xff]   ;;  %v935_v2 = vld [vmem:[#allocation7 + $0x30] sm:$0xff]  }
  0x3c   :  { %905 = vmatprep.subr.bf16.mxu0 %v1111_v0  ;;  %921 = vmatprep.mubr.msk.bf16.mxu0 %vm1112_vm0, %v1111_v0  ;;  %v936_v3 = vld [vmem:[#allocation7 + $0x28] sm:$0xff]   ;;  %v941_v4 = vld [vmem:[#allocation8 + $0x78] sm:$0xff]   ;;  %v937_v6 = vld [vmem:[#allocation7 + $0x20] sm:$0xff]   ;;  %vm758_vm1 = vcmask 7168  }
  0x3d   :  { %906 = vmatpush3.bf16.msra.mxu0 %v934_v1  ;;  %v942_v5 = vld [vmem:[#allocation8 + $0x38] sm:$0xff]   ;;  %839 = vmatprep.subr.bf16.mxu1 %v941_v4  ;;  %v944_v7 = vld [vmem:[#allocation8 + $0x70] sm:$0xff]   ;;  %v948_v10 = vld [vmem:[#allocation8 + $0x68] sm:$0xff]  }
  0x3e   :  { %907 = vmatprep.subr.bf16.mxu0 %v1111_v0  ;;  %840 = vmatpush3.bf16.msra.mxu1 %v942_v5  ;;  %v945_v8 = vld [vmem:[#allocation8 + $0x30] sm:$0xff]   ;;  %v938_v9 = vld [vmem:[#allocation7 + $0x18] sm:$0xff]   ;;  %v949_v11 = vld [vmem:[#allocation8 + $0x28] sm:$0xff]  }
  0x3f   :  { %841 = vmatprep.subr.bf16.mxu1 %v944_v7  ;;  %v939_v12 = vld [vmem:[#allocation7 + $0x10] sm:$0xff]   ;;  %v952_v13 = vld [vmem:[#allocation8 + $0x60] sm:$0xff]   ;;  %v940_v15 = vld [vmem:[#allocation7 + $0x8] sm:$0xff]  }
  0x40   :  { %v953_v14 = vld [vmem:[#allocation8 + $0x20] sm:$0xff]   ;;  %v956_v16 = vld [vmem:[#allocation8 + $0x58] sm:$0xff]   ;;  %v960_v20 = vld [vmem:[#allocation8 + $0x50] sm:$0xff]  }
  0x41   :  { %908 = vmatpush3.bf16.msra.mxu0 %v935_v2  ;;  %v957_v17 = vld [vmem:[#allocation8 + $0x18] sm:$0xff]   ;;  %v943_v18 = vld [vmem:[#allocation7] sm:$0xff]   ;;  %v95_v21 = vld [vmem:[#allocation3] sm:$0xf] }
  0x42   :  { %909 = vmatprep.subr.bf16.mxu0 %v1111_v0  ;;  %842 = vmatpush3.bf16.msra.mxu1 %v945_v8  ;;  %v946_v19 = vld [vmem:[#allocation8 + $0xf8] sm:$0xff]   ;;  %v961_v22 = vld [vmem:[#allocation8 + $0x10] sm:$0xff]   ;;  %v964_v25 = vld [vmem:[#allocation8 + $0x48] sm:$0xff]   ;;  %v553_v8 = vlaneseq }
  0x43   :  { %843 = vmatprep.subr.bf16.mxu1 %v948_v10  ;;  %v947_v23 = vld [vmem:[#allocation8 + $0xb8] sm:$0xff]   ;;  %v950_v24 = vld [vmem:[#allocation8 + $0xf0] sm:$0xff]   ;;  %v965_v26 = vld [vmem:[#allocation8 + $0x8] sm:$0xff]  }
  0x44   :  { %v951_v27 = vld [vmem:[#allocation8 + $0xb0] sm:$0xff]   ;;  %v954_v28 = vld [vmem:[#allocation8 + $0xe8] sm:$0xff]   ;;  %v968_v29 = vld [vmem:[#allocation8 + $0x40] sm:$0xff]  }
  0x45   :  { %910 = vmatpush3.bf16.msra.mxu0 %v936_v3  ;;  %v969_v30 = vld [vmem:[#allocation8] sm:$0xff]   ;;  %v200_v31 = vld [vmem:[#allocation5] sm:$0xff]  ;;  %v955_v32 = vld [vmem:[#allocation8 + $0xa8] sm:$0xff]  }
  0x46   :  { %911 = vmatprep.subr.bf16.mxu0 %v1111_v0  ;;  %844 = vmatpush3.bf16.msra.mxu1 %v949_v11  ;;  %v775_v33 = vcombine.low %v200_v31, %v200_v31  ;;  %v776_v34 = vcombine.high %v200_v31, %v200_v31  ;;  %v958_v35 = vld [vmem:[#allocation8 + $0xe0] sm:$0xff]   ;;  %v201_v36 = vld [vmem:[#allocation5 + $0x8] sm:$0xff]  ;;  %v966_v41 = vld [vmem:[#allocation8 + $0xd0] sm:$0xff]  }
  0x47   :  { %845 = vmatprep.subr.bf16.mxu1 %v952_v13  ;;  %v959_v37 = vld [vmem:[#allocation8 + $0xa0] sm:$0xff]   ;;  %v962_v38 = vld [vmem:[#allocation8 + $0xd8] sm:$0xff]   ;;  %v778_v39 = vcombine.high %v201_v36, %v201_v36  ;;  %v967_v42 = vld [vmem:[#allocation8 + $0x90] sm:$0xff]   ;;  %v777_v47 = vcombine.low %v201_v36, %v201_v36 }
  0x48   :  { %504 = vmatprep.mubr.bf16.mxu1 %v776_v34  ;;  %v963_v40 = vld [vmem:[#allocation8 + $0x98] sm:$0xff]   ;;  %v970_v43 = vld [vmem:[#allocation8 + $0xc8] sm:$0xff]   ;;  %v974_v45 = vld [vmem:[#allocation8 + $0xc0] sm:$0xff]  }
  0x49   :  { %912 = vmatpush3.bf16.msra.mxu0 %v937_v6  ;;  %v973_v44 = vld [vmem:[#allocation8 + $0x88] sm:$0xff]   ;;  %v975_v46 = vld [vmem:[#allocation8 + $0x80] sm:$0xff]   ;;  %v978_v48 = vld [vmem:[#allocation10 + $0x78] sm:$0xff]  }
  0x4a   :  { %913 = vmatprep.subr.bf16.mxu0 %v1111_v0  ;;  %846 = vmatpush3.bf16.msra.mxu1 %v953_v14  ;;  %v979_v49 = vld [vmem:[#allocation10 + $0x38] sm:$0xff]   ;;  %v980_v50 = vld [vmem:[#allocation10 + $0x70] sm:$0xff]   ;;  %v982_v52 = vld [vmem:[#allocation10 + $0x68] sm:$0xff]  }
  0x4b   :  { %847 = vmatprep.subr.bf16.mxu1 %v956_v16  ;;  %v981_v51 = vld [vmem:[#allocation10 + $0x30] sm:$0xff]   ;;  %v983_v53 = vld [vmem:[#allocation10 + $0x28] sm:$0xff]   ;;  %v984_v54 = vld [vmem:[#allocation10 + $0x60] sm:$0xff]  }
  0x4c   :  { %v985_v55 = vld [vmem:[#allocation10 + $0x20] sm:$0xff]   ;;  %v986_v56 = vld [vmem:[#allocation10 + $0x58] sm:$0xff]   ;;  %v988_v58 = vld [vmem:[#allocation10 + $0x50] sm:$0xff]  }
  0x4d   :  { %914 = vmatpush3.bf16.msra.mxu0 %v938_v9  ;;  %v987_v57 = vld [vmem:[#allocation10 + $0x18] sm:$0xff]   ;;  %v989_v59 = vld [vmem:[#allocation10 + $0x10] sm:$0xff]   ;;  %v990_v60 = vld [vmem:[#allocation10 + $0x48] sm:$0xff]   ;;  %v554_v9 = vshrl.u32 %v553_v8, 7 }
  0x4e   :  { %915 = vmatprep.subr.bf16.mxu0 %v1111_v0  ;;  %848 = vmatpush3.bf16.msra.mxu1 %v957_v17  ;;  %v991_v61 = vld [vmem:[#allocation10 + $0x8] sm:$0xff]   ;;  %v992_v62 = vld [vmem:[#allocation10 + $0x40] sm:$0xff]  }
  0x4f   :  { %849 = vmatprep.subr.bf16.mxu1 %v960_v20  ;;  %v993_v63 = vld [vmem:[#allocation10] sm:$0xff]   ;;  %v555_v10 = vsub.s32 0, %v554_v9  ;;  %v92_v11 = vld [vmem:[%s1197_s5] ss:$4 sm:$0x3] }
  0x51   :  { %916 = vmatpush3.bf16.msra.mxu0 %v939_v12  ;;  %v559_v12 = vsub.s32 1, %v554_v9  ;;  %v556_v13 = vrot.slane %v92_v11, %v555_v10 }
  0x52   :  { %917 = vmatprep.subr.bf16.mxu0 %v1111_v0  ;;  %850 = vmatpush3.bf16.msra.mxu1 %v961_v22 }
  0x53   :  { %851 = vmatprep.subr.bf16.mxu1 %v964_v25  ;;  %v560_v16 = vrot.slane %v92_v11, %v559_v12 }
  0x55   :  { %918 = vmatpush3.bf16.msra.mxu0 %v940_v15 }
  0x56   :  { %919 = vmatprep.subr.bf16.mxu0 %v1111_v0  ;;  %852 = vmatpush3.bf16.msra.mxu1 %v965_v26 }
  0x57   :  { %853 = vmatprep.subr.bf16.mxu1 %v968_v29 }
  0x59   :  { %920 = vmatpush3.bf16.msra.mxu0 %v943_v18 }
  0x5a   :  { %861 = vmatprep.subr.bf16.mxu0 %v946_v19  ;;  %854 = vmatpush3.bf16.msra.mxu1 %v969_v30  ;;  %v811_v30 = vld [vmem:[%s1197_s5 + $0x1] ss:$0 sm:$0xff] }
  0x5b   :  { %883 = vmatprep.subr.bf16.mxu1 %v978_v48 }
  0x5c   :  { %922 = vmatmul.mubr.bf16.vlgmr.msra.gmra.mxu0 %v95_v21 }
  0x5d   :  { %862 = vmatpush3.bf16.msra.mxu0 %v947_v23  ;;  %505 = vmatmul.mubr.bf16.vlgmr.msra.gmra.mxu1 %v775_v33 }
  0x5e   :  { %863 = vmatprep.subr.bf16.mxu0 %v950_v24  ;;  %544 = vmatprep.mubr.bf16.mxu0 %v778_v39 }
  0x5f   :  { %884 = vmatpush3.bf16.msra.mxu1 %v979_v49 }
  0x60   :  { %885 = vmatprep.subr.bf16.mxu1 %v980_v50 }
  0x61   :  { %864 = vmatpush3.bf16.msra.mxu0 %v951_v27 }
  0x62   :  { %865 = vmatprep.subr.bf16.mxu0 %v954_v28 }
  0x63   :  { %886 = vmatpush3.bf16.msra.mxu1 %v981_v51 }
  0x64   :  { %887 = vmatprep.subr.bf16.mxu1 %v982_v52 }
  0x65   :  { %866 = vmatpush3.bf16.msra.mxu0 %v955_v32 }
  0x66   :  { %867 = vmatprep.subr.bf16.mxu0 %v958_v35  ;;  %v828_v35 = vld [vmem:[%s1197_s5 + $0x2] ss:$0 sm:$0xff] }
  0x67   :  { %888 = vmatpush3.bf16.msra.mxu1 %v983_v53 }
  0x68   :  { %889 = vmatprep.subr.bf16.mxu1 %v984_v54 }
  0x69   :  { %868 = vmatpush3.bf16.msra.mxu0 %v959_v37 }
  0x6a   :  { %869 = vmatprep.subr.bf16.mxu0 %v962_v38  ;;  %v750_v38 = vstv %s1198_s6 }
  0x6b   :  { %890 = vmatpush3.bf16.msra.mxu1 %v985_v55 }
  0x6c   :  { %891 = vmatprep.subr.bf16.mxu1 %v986_v56 }
  0x6d   :  { %870 = vmatpush3.bf16.msra.mxu0 %v963_v40 }
  0x6e   :  { %871 = vmatprep.subr.bf16.mxu0 %v966_v41 }
  0x6f   :  { %892 = vmatpush3.bf16.msra.mxu1 %v987_v57 }
  0x70   :  { %893 = vmatprep.subr.bf16.mxu1 %v988_v58 }
  0x71   :  { %872 = vmatpush3.bf16.msra.mxu0 %v967_v42 }
  0x72   :  { %873 = vmatprep.subr.bf16.mxu0 %v970_v43 }
  0x73   :  { %894 = vmatpush3.bf16.msra.mxu1 %v989_v59 }
  0x74   :  { %895 = vmatprep.subr.bf16.mxu1 %v990_v60 }
  0x75   :  { %874 = vmatpush3.bf16.msra.mxu0 %v973_v44 }
  0x76   :  { %875 = vmatprep.subr.bf16.mxu0 %v974_v45 }
  0x77   :  { %896 = vmatpush3.bf16.msra.mxu1 %v991_v61 }
  0x78   :  { %897 = vmatprep.subr.bf16.mxu1 %v992_v62 }
  0x79   :  { %876 = vmatpush3.bf16.msra.mxu0 %v975_v46 }
  0x7b   :  { %898 = vmatpush3.bf16.msra.mxu1 %v993_v63 }
  0x7c   :  { %545 = vmatmul.mubr.bf16.vlgmr.msra.gmra.mxu0 %v777_v47 }
 0x11c   :  { %v194_v0 = vpop.f32.mrf.mxu0 }
 0x11d   :  { %v855_v4 = vpop.f32.mrf.mxu1  ;;  %v563_v19 = vadd.f32 %v556_v13, %v194_v0 }
 0x11e   :  { %v923_v1 = vpop.f32.mrf.mxu0 }
 0x11f   :  { %v856_v5 = vpop.f32.mrf.mxu1  ;;  %v565_v24 = vmax.f32 %v563_v19, 0.0 }
 0x120   :  { %v197_v2 = vpop.f32.mrf.mxu0  ;;  %v857_v17 = vadd.f32 %v856_v5, %v855_v4 }
 0x121   :  { %v858_v6 = vpop.f32.mrf.mxu1  ;;  %v567_v27 = vpack.c.bf16 %v565_v24, %v565_v24 }
 0x122   :  { %v924_v3 = vpop.f32.mrf.mxu0 }
 0x123   :  { %v859_v7 = vpop.f32.mrf.mxu1 }
 0x13c   :  { %v877_v14 = vpop.f32.mrf.mxu0 }
 0x13e   :  { %v878_v15 = vpop.f32.mrf.mxu0 }
 0x13f   :  { %v879_v18 = vadd.f32 %v878_v15, %v877_v14 }
 0x140   :  { %v880_v20 = vpop.f32.mrf.mxu0 }
 0x141   :  { %v547_v21 = vadd.f32 %v879_v18, %v857_v17 }
 0x142   :  { %v881_v22 = vpop.f32.mrf.mxu0 }
 0x143   :  { %v564_v23 = vadd.f32 %v560_v16, %v547_v21 }
 0x145   :  { %v566_v25 = vmax.f32 %v564_v23, 0.0 }
 0x147   :  { %v568_v26 = vpack.c.bf16 %v566_v25, %v566_v25 }
 0x149   :  { %733 = vmatprep.mubr.bf16.mxu1 %v568_v26 }
 0x14a   :  { %734 = vmatmul.mubr.bf16.vlgmr.msra.gmra.mxu1 %v567_v27 }
 0x20a   :  { %v899_v28 = vpop.f32.mrf.mxu1 }
 0x20c   :  { %v900_v29 = vpop.f32.mrf.mxu1 }
 0x20d   :  { %v901_v31 = vadd.f32 %v900_v29, %v899_v28 }
 0x20e   :  { %v902_v32 = vpop.f32.mrf.mxu1 }
 0x20f   :  { %v736_v33 = vadd.f32 %v901_v31, %v811_v30 }
 0x210   :  { %v903_v34 = vpop.f32.mrf.mxu1 }
 0x211   :  { %v741_v36 = vmax.f32 %v736_v33, 0.0 }
 0x213   :  { %v746_v37 = vmul.f32 %v828_v35, %v741_v36 }
 0x215   :  { %747 = vadd.xlane.f32.xlu0 %v746_v37 }
 0x29e   :  { %v748_v39 = vpop.xlane.xlu0 %747 }
 0x29f   :  { %v751_v40 = vadd.f32 %v750_v38, %v748_v39 }
 0x2a1   :  { %v829_v41 = vmul.f32 -1.442695, %v751_v40 }
 0x2a3   :  { %994 = vpow2.f32 %v829_v41 }
 0x2b0   :  { %v995_v42 = vpop.eup %994 }
 0x2b1   :  { %v755_v43 = vadd.f32 1.0, %v995_v42 }
 0x2b3   :  { %996 = vrcp.f32 %v755_v43 }
 0x2c0   :  { %v997_v44 = vpop.eup %996 }
 0x2c1   :  { %759 = vst.msk [vmem:[%s1199_s7] sm:$0xff] %vm758_vm1, %v997_v44 }
 0x2c2   :  { %764 = vsyncpa [#allocation4], 1 }
 0x2c3   :  { %765 = vsyncpa [#allocation6], 1 }
 0x2c4   :  { %766 = vsyncpa [#allocation9], 1 }

</bundles_post_ra>
